<compile_context>
chip_gen: v5e
topology: v5e:2x2
jax: 0.10.0
libtpu: 0.0.40
codegen_flags: <defaults>
</compile_context>

<pallas_src>
import jax
import jax.numpy as jnp
from jax import lax
from jax.experimental import pallas as pl
from jax.experimental.pallas import tpu as pltpu


def _make_kernel(KH, Hout):
    def kernel(x_ref, w_ref, b_ref, out_ref):
        # x_ref  : (Bt, Hpad, Wpad*2Ci)      merged time*channel lanes, [real||imag]
        # w_ref  : (KH, Wpad*2Ci, Wout*2Co)  Toeplitz-expanded combined complex weight
        # b_ref  : (1, Wout*2Co)             combined bias (f32), tiled over time lanes
        # out_ref: (Bt, Hout, Wout*2Co)      lane-dense [.., w, (real||imag)] slab
        Bt = x_ref.shape[0]
        K = x_ref.shape[2]
        N = out_ref.shape[2]
        acc = jnp.zeros((Bt * Hout, N), jnp.float32)
        for kh in range(KH):  # static, small: freq taps only
            lhs = x_ref[:, pl.ds(kh, Hout), :].reshape(Bt * Hout, K)
            acc = acc + jnp.dot(lhs, w_ref[kh], preferred_element_type=jnp.float32)
        acc = acc + b_ref[...]
        out_ref[...] = acc.reshape(Bt, Hout, N).astype(out_ref.dtype)

    return kernel


def _pick_batch_block(B, bytes_per_batch, budget_bytes=4 << 20):
    """Largest divisor of B within a small VMEM budget, keeping >=2 grid steps
    when B > 1 so both v7x TensorCores get work on the 'parallel' batch axis."""
    best = 1
    for d in range(1, B + 1):
        if B % d:
            continue
        if d * bytes_per_batch > budget_bytes:
            continue
        if B > 1 and B // d < 2:
            continue
        best = d
    return best


def complex_conv2d_pallas(x, wr_oihw, wi_oihw, br, bi, *,
                          kernel_size, stride=(1, 1), padding=(0, 0),
                          dilation=1, groups=1, causal=False,
                          compute_dtype=jnp.bfloat16):
    """x: NCHW [B, in_channels, D, T].  Weights in PyTorch OIHW layout."""
    assert tuple(stride) == (1, 1) and dilation == 1 and groups == 1

    B, C, _, _ = x.shape
    Ci = C // 2
    Co = wr_oihw.shape[0]
    KH, KW = kernel_size
    pad_d, pad_t = padding
    out_dtype = x.dtype

    # ---- padding (matches the PyTorch forward) -------------------------------
    if pad_t != 0 and causal:
        x = jnp.pad(x, ((0, 0), (0, 0), (0, 0), (pad_t, 0)))
    else:
        x = jnp.pad(x, ((0, 0), (0, 0), (0, 0), (pad_t, pad_t)))
    x = jnp.pad(x, ((0, 0), (0, 0), (pad_d, pad_d), (0, 0)))  # conv's own D padding

    # ---- wrapper-side layout: NHWC with time*channel merged into lanes -------
    Cin2, Cout2 = 2 * Ci, 2 * Co
    x_nhwc = jnp.transpose(x, (0, 2, 3, 1))                   # (B, Hpad, Wpad, 2Ci)
    Hpad, Wpad = x_nhwc.shape[1], x_nhwc.shape[2]
    Hout = Hpad - KH + 1
    Wout = Wpad - KW + 1
    x_m = x_nhwc.reshape(B, Hpad, Wpad * Cin2).astype(compute_dtype)

    # ---- combined complex weight: [xr||xi] @ [[wr, wi], [-wi, wr]] -----------
    wr = jnp.transpose(wr_oihw, (2, 3, 1, 0))                 # (KH, KW, Ci, Co)
    wi = jnp.transpose(wi_oihw, (2, 3, 1, 0))
    w_comb = jnp.concatenate(
        [jnp.concatenate([wr, wi], axis=-1),                  # rows for real inputs
         jnp.concatenate([-wi, wr], axis=-1)],                # rows for imag inputs
        axis=2)                                               # (KH, KW, 2Ci, 2Co)

    # Toeplitz expansion over the merged time*channel axis:
    #   WT[kh, w'*2Ci + c, w*2Co + co] = w_comb[kh, w'-w, c, co] if 0 <= w'-w < KW
    wp = jnp.arange(Wpad)[:, None]
    wo = jnp.arange(Wout)[None, :]
    kw_idx = wp - wo                                          # (Wpad, Wout)
    valid = (kw_idx >= 0) & (kw_idx < KW)
    kw_safe = jnp.clip(kw_idx, 0, KW - 1)
    t = w_comb[:, kw_safe, :, :]                              # (KH, Wpad, Wout, 2Ci, 2Co)
    t = jnp.where(valid[None, :, :, None, None], t, 0.0)
    t = jnp.transpose(t, (0, 1, 3, 2, 4))                     # (KH, Wpad, 2Ci, Wout, 2Co)
    w_toep = t.reshape(KH, Wpad * Cin2, Wout * Cout2).astype(compute_dtype)

    # Combined bias (real gets br - bi, imag gets br + bi), tiled over time lanes.
    b_comb = jnp.concatenate([br - bi, br + bi]).astype(jnp.float32)    # (2Co,)
    b_lane = jnp.tile(b_comb.reshape(1, Cout2), (1, Wout))              # (1, Wout*2Co)

    # ---- batch blocking -------------------------------------------------------
    itemsize = jnp.dtype(compute_dtype).itemsize
    bytes_per_batch = (Hpad * Wpad * Cin2 * itemsize
                       + Hout * Wout * Cout2 * (4 + jnp.dtype(out_dtype).itemsize))
    Bt = _pick_batch_block(B, 3 * bytes_per_batch)   # ~double-buffered + slack
    grid = (B // Bt,)

    Kdim = Wpad * Cin2
    Ndim = Wout * Cout2

    out_slab = pl.pallas_call(
        _make_kernel(KH, Hout),
        out_shape=jax.ShapeDtypeStruct((B, Hout, Ndim), out_dtype),
        grid_spec=pltpu.PrefetchScalarGridSpec(
            num_scalar_prefetch=0,
            grid=grid,
            in_specs=[
                pl.BlockSpec((Bt, Hpad, Kdim), lambda b: (b, 0, 0)),
                pl.BlockSpec((KH, Kdim, Ndim), lambda b: (0, 0, 0)),
                pl.BlockSpec((1, Ndim), lambda b: (0, 0)),
            ],
            out_specs=pl.BlockSpec((Bt, Hout, Ndim), lambda b: (b, 0, 0)),
        ),
        compiler_params=pltpu.CompilerParams(dimension_semantics=("parallel",)),
    )(x_m, w_toep, b_lane)

    out_nhwc = out_slab.reshape(B, Hout, Wout, Cout2)
    return jnp.transpose(out_nhwc, (0, 3, 1, 2))              # NCHW, [real || imag]


def complex_conv2d_reference(x, wr, wi, br, bi, *, padding, causal, cast_dtype=None):
    """Pure-JAX reference mirroring the PyTorch forward (NCHW / OIHW)."""
    pad_d, pad_t = padding
    if pad_t != 0 and causal:
        x = jnp.pad(x, ((0, 0), (0, 0), (0, 0), (pad_t, 0)))
    else:
        x = jnp.pad(x, ((0, 0), (0, 0), (0, 0), (pad_t, pad_t)))
    if cast_dtype is not None:
        x, wr, wi = x.astype(cast_dtype), wr.astype(cast_dtype), wi.astype(cast_dtype)
    xr, xi = jnp.split(x, 2, axis=1)

    def conv(inp, w, b):
        y = lax.conv_general_dilated(
            inp, w, window_strides=(1, 1),
            padding=[(pad_d, pad_d), (0, 0)],
            dimension_numbers=('NCHW', 'OIHW', 'NCHW'),
            preferred_element_type=jnp.float32)
        return y + b[None, :, None, None].astype(jnp.float32)

    real = conv(xr, wr, br) - conv(xi, wi, bi)
    imag = conv(xr, wi, bi) + conv(xi, wr, br)
    return jnp.concatenate([real, imag], axis=1)


if __name__ == "__main__":
    # Module config (consistent with ComplexConv2d.__init__).
    in_channels, out_channels = 8, 8
    kernel_size = (3, 3)
    padding = (1, 1)
    causal = False
    Ci, Co = in_channels // 2, out_channels // 2
    KH, KW = kernel_size
    B, D, T = 2, 16, 16

    key = jax.random.PRNGKey(0)
    kx, kwr, kwi = jax.random.split(key, 3)
    x = jax.random.normal(kx, (B, in_channels, D, T), dtype=jnp.float32)
    # nn.init.normal_(std=0.05) for weights; biases init to 0.0.
    wr = 0.05 * jax.random.normal(kwr, (Co, Ci, KH, KW), dtype=jnp.float32)
    wi = 0.05 * jax.random.normal(kwi, (Co, Ci, KH, KW), dtype=jnp.float32)
    br = jnp.zeros((Co,), jnp.float32)
    bi = jnp.zeros((Co,), jnp.float32)

    # Strict correctness check: f32 compute path vs. f32 reference.
    out_f32 = complex_conv2d_pallas(x, wr, wi, br, bi, kernel_size=kernel_size,
                                    padding=padding, causal=causal,
                                    compute_dtype=jnp.float32)
    out_f32 = jax.block_until_ready(out_f32)
    ref_f32 = jax.block_until_ready(
        complex_conv2d_reference(x, wr, wi, br, bi, padding=padding, causal=causal))
    assert out_f32.shape == ref_f32.shape, (out_f32.shape, ref_f32.shape)
    err_f32 = float(jnp.max(jnp.abs(out_f32 - ref_f32)))
    assert err_f32 < 1e-3, err_f32

    # Fast path (default bf16 inputs/weights, f32 accumulation) vs. a reference
    # that casts the same way.
    out_bf16 = complex_conv2d_pallas(x, wr, wi, br, bi, kernel_size=kernel_size,
                                     padding=padding, causal=causal)
    out_bf16 = jax.block_until_ready(out_bf16)
    ref_bf16 = jax.block_until_ready(
        complex_conv2d_reference(x, wr, wi, br, bi, padding=padding, causal=causal,
                                 cast_dtype=jnp.bfloat16))
    err_bf16 = float(jnp.max(jnp.abs(out_bf16 - ref_bf16)))
    assert err_bf16 < 5e-3, err_bf16

    print("KERNEL_OK")
</pallas_src>

<mosaic_0001>
module attributes {stable_mosaic.version = 11 : i64} {
  func.func @kernel(%arg0: i32, %arg1: memref<1x18x144xf32, #tpu.memory_space<vmem>>, %arg2: memref<3x144x128xf32, #tpu.memory_space<vmem>>, %arg3: memref<1x128xf32, #tpu.memory_space<vmem>>, %arg4: memref<1x16x128xf32, #tpu.memory_space<vmem>>) attributes {dimension_semantics = [#tpu.dimension_semantics<parallel>], iteration_bounds = array<i64: 2>, scalar_prefetch = 0 : i64, scratch_operands = 0 : i64, tpu.core_type = #tpu.core_type<tc>, window_params = [{transform_indices = @transform_0, window_bounds = array<i64: 1, 18, 144>}, {pipeline_mode = #tpu.pipeline_mode<synchronous>, transform_indices = @transform_1, window_bounds = array<i64: 3, 144, 128>}, {pipeline_mode = #tpu.pipeline_mode<synchronous>, transform_indices = @transform_2, window_bounds = array<i64: 1, 128>}, {transform_indices = @transform_3, window_bounds = array<i64: 1, 16, 128>}]} {
    %cst = arith.constant 0.000000e+00 : f32
    %0 = vector.broadcast %cst : f32 to vector<16x128xf32>
    %c0 = arith.constant 0 : index
    %c0_0 = arith.constant 0 : index
    %c0_1 = arith.constant 0 : index
    %1 = vector.load %arg1[%c0, %c0_0, %c0_1] : memref<1x18x144xf32, #tpu.memory_space<vmem>>, vector<1x16x144xf32>
    %2 = vector.shape_cast %1 : vector<1x16x144xf32> to vector<16x144xf32>
    %c0_2 = arith.constant 0 : index
    %c0_3 = arith.constant 0 : index
    %c0_4 = arith.constant 0 : index
    %3 = vector.load %arg2[%c0_2, %c0_3, %c0_4] : memref<3x144x128xf32, #tpu.memory_space<vmem>>, vector<1x144x128xf32>
    %4 = vector.shape_cast %3 : vector<1x144x128xf32> to vector<144x128xf32>
    %cst_5 = arith.constant dense<0.000000e+00> : vector<16x128xf32>
    %5 = tpu.matmul %2, %4, %cst_5 {dimension_numbers = #tpu.dot_dimension_numbers<[1], [0], [0], [1], [0, 0, 1, 1], [], []>} : vector<16x144xf32>, vector<144x128xf32>, vector<16x128xf32> -> vector<16x128xf32>
    %6 = arith.addf %0, %5 : vector<16x128xf32>
    %c0_6 = arith.constant 0 : index
    %c1 = arith.constant 1 : index
    %c0_7 = arith.constant 0 : index
    %7 = vector.load %arg1[%c0_6, %c1, %c0_7] : memref<1x18x144xf32, #tpu.memory_space<vmem>>, vector<1x16x144xf32>
    %8 = vector.shape_cast %7 : vector<1x16x144xf32> to vector<16x144xf32>
    %c1_8 = arith.constant 1 : index
    %c0_9 = arith.constant 0 : index
    %c0_10 = arith.constant 0 : index
    %9 = vector.load %arg2[%c1_8, %c0_9, %c0_10] : memref<3x144x128xf32, #tpu.memory_space<vmem>>, vector<1x144x128xf32>
    %10 = vector.shape_cast %9 : vector<1x144x128xf32> to vector<144x128xf32>
    %cst_11 = arith.constant dense<0.000000e+00> : vector<16x128xf32>
    %11 = tpu.matmul %8, %10, %cst_11 {dimension_numbers = #tpu.dot_dimension_numbers<[1], [0], [0], [1], [0, 0, 1, 1], [], []>} : vector<16x144xf32>, vector<144x128xf32>, vector<16x128xf32> -> vector<16x128xf32>
    %12 = arith.addf %6, %11 : vector<16x128xf32>
    %c0_12 = arith.constant 0 : index
    %c2 = arith.constant 2 : index
    %c0_13 = arith.constant 0 : index
    %13 = vector.load %arg1[%c0_12, %c2, %c0_13] : memref<1x18x144xf32, #tpu.memory_space<vmem>>, vector<1x16x144xf32>
    %14 = vector.shape_cast %13 : vector<1x16x144xf32> to vector<16x144xf32>
    %c2_14 = arith.constant 2 : index
    %c0_15 = arith.constant 0 : index
    %c0_16 = arith.constant 0 : index
    %15 = vector.load %arg2[%c2_14, %c0_15, %c0_16] : memref<3x144x128xf32, #tpu.memory_space<vmem>>, vector<1x144x128xf32>
    %16 = vector.shape_cast %15 : vector<1x144x128xf32> to vector<144x128xf32>
    %cst_17 = arith.constant dense<0.000000e+00> : vector<16x128xf32>
    %17 = tpu.matmul %14, %16, %cst_17 {dimension_numbers = #tpu.dot_dimension_numbers<[1], [0], [0], [1], [0, 0, 1, 1], [], []>} : vector<16x144xf32>, vector<144x128xf32>, vector<16x128xf32> -> vector<16x128xf32>
    %18 = arith.addf %12, %17 : vector<16x128xf32>
    %c0_18 = arith.constant 0 : index
    %c0_19 = arith.constant 0 : index
    %19 = vector.load %arg3[%c0_18, %c0_19] : memref<1x128xf32, #tpu.memory_space<vmem>>, vector<1x128xf32>
    %20 = vector.broadcast %19 : vector<1x128xf32> to vector<16x128xf32>
    %21 = arith.addf %18, %20 : vector<16x128xf32>
    %22 = vector.shape_cast %21 : vector<16x128xf32> to vector<1x16x128xf32>
    %c0_20 = arith.constant 0 : index
    %c0_21 = arith.constant 0 : index
    %c0_22 = arith.constant 0 : index
    %23 = vector.load %arg4[%c0_20, %c0_21, %c0_22] : memref<1x16x128xf32, #tpu.memory_space<vmem>>, vector<1x16x128xf32>
    tpu.vector_store %arg4[%c0_20, %c0_21, %c0_22], %22 {strides = array<i32>} : memref<1x16x128xf32, #tpu.memory_space<vmem>>, vector<1x16x128xf32>,
    return
  }
  func.func @transform_0(%arg0: i32) -> (i32, i32, i32) {
    %c0_i32 = arith.constant 0 : i32
    %c0_i32_0 = arith.constant 0 : i32
    %c0_i32_1 = arith.constant 0 : i32
    return %arg0, %c0_i32, %c0_i32_0 : i32, i32, i32
  }
  func.func @transform_1(%arg0: i32) -> (i32, i32, i32) {
    %c0_i32 = arith.constant 0 : i32
    %c0_i32_0 = arith.constant 0 : i32
    %c0_i32_1 = arith.constant 0 : i32
    %c0_i32_2 = arith.constant 0 : i32
    return %c0_i32, %c0_i32_0, %c0_i32_1 : i32, i32, i32
  }
  func.func @transform_2(%arg0: i32) -> (i32, i32) {
    %c0_i32 = arith.constant 0 : i32
    %c0_i32_0 = arith.constant 0 : i32
    %c0_i32_1 = arith.constant 0 : i32
    return %c0_i32, %c0_i32_0 : i32, i32
  }
  func.func @transform_3(%arg0: i32) -> (i32, i32, i32) {
    %c0_i32 = arith.constant 0 : i32
    %c0_i32_0 = arith.constant 0 : i32
    %c0_i32_1 = arith.constant 0 : i32
    return %arg0, %c0_i32, %c0_i32_0 : i32, i32, i32
  }
}

</mosaic_0001>

<bundles_post_ra>
// kernel: tpu_custom_call.1
= control target key start
LH: loop header
LB: loop body
LE: loop exit
PB: predicated region body
PF: predicated region fallthrough
CT: control target
= control target key end

     0   :  { %8 = vsyncpa [#allocation3], 0  ;;  %s877_s0 = inlined_call_operand.vmem [shape: f32[2,18,144], index: 0, kind: input, shape index: {}]   ;;  %s878_s1 = inlined_call_operand.hbm [shape: f32[3,144,128], index: 1, kind: input, shape index: {}]   ;;  %s879_s2 = inlined_call_operand.vmem [shape: f32[1,128], index: 2, kind: input, shape index: {}]   ;;  %s880_s3 = inlined_call_operand.hbm [shape: f32[2,16,128], index: 3, kind: output, shape index: {}]  }
   0x1   :  { %9 = vsyncpa [#allocation4], 0 }
   0x2   :  { %11 = vsyncpa [#allocation4 + $0x1], 0  ;;  %s741_s12 = smov 0   ;;  %s743_s13 = smov 0  }
   0x3   :  { %s745_s14 = smov 0   ;;  %s747_s15 = smov 0  }
   0x4 LB: > { %s762_s16 = sadd.s32 4294967295, %s714_s15   ;;  %s542_s17 = sadd.s32 4294967294, %s714_s15   ;;  %s714_s15 = sphi %s747_s15, %s886_s15   ;;  %s710_s14 = sphi %s745_s14, %s885_s14   ;;  %s706_s13 = sphi %s743_s13, %s884_s13   ;;  %s702_s12 = sphi %s741_s12, %s883_s12  }
   0x5   : > { %s766_s18 = sadd.s32 1, %s714_s15   ;;  %s92_s19 = sadd.s32 1, %s710_s14 }
   0x6   : > { %s89_s20 = ssub.s32 %s714_s15, %s766_s18  ;;  %p102_p0 = scmp.ne.s32.totalorder %s710_s14, %s706_s13 }
   0x7   : > { %p90_p1 = scmp.eq.s32.totalorder %s89_s20, 0  ;;  %p103_p2 = scmp.eq.s32.totalorder %s762_s16, 1 }
   0x8   : > { %p108_p3 = scmp.ne.s32.totalorder %s706_s13, %s702_s12  ;;  %p109_p4 = scmp.eq.s32.totalorder %s542_s17, 1 }
   0x9   : > { %s777_s21 = scalar_select %p90_p1, %s710_s14, %s92_s19  }
   0xa   : > { %p779_p5 = por %p103_p2, %p102_p0  ;;  %p783_p6 = por %p109_p4, %p108_p3 }
   0xb   : > { %p543_p7 = scmp.ge.s32.totalorder %s714_s15, 1  ;;  %p116_p8 = scmp.lt.s32.totalorder %s714_s15, 3 }
   0xc   : > { %p577_p9 = scmp.eq.s32.totalorder %s762_s16, 0  ;;  %s127_s26 = sshll.u32 %s878_s1, 4  ;;  %s128_s26 = int_to_ptr.hbm [resolvable:$true] %s127_s26 }
   0xd   : > { %p117_p10 = pnand %p543_p7, %p116_p8  ;;  %s716_s27 = smov [#allocation2]  }
   0xe   : > { %s129_s28 = sshll.u32 %s716_s27, 4  ;;  %s717_s29 = smov 128   ;;  %s130_s28 = int_to_ptr.vmem [resolvable:$true] %s129_s28 }
   0xf   : > { %p569_p11 = pneg %p117_p10  ;;  %s718_s30 = smov 8  }
  0x10   : > { %156 = sbr.rel (%p117_p10) target bundleno = 207 (0xcf), region = 32 }
  0x11   : > { %p570_p12 = pnand %p577_p9, %p569_p11 }
  0x13   : > { %572 = dma.hbm_to_vmem [thread:$0]  (!%p570_p12), %s128_s26, 6912, %s130_s28, [#allocation3], %s717_s29, %s717_s29, %s718_s30  }
  0x15   : > { %693 = dma.done.wait (%p577_p9), [#allocation3], 6912  }
  0x16   : > { %695 = vsyncadd (%p577_p9), [#allocation3], 4294960384  ;;  %p181_p13 = scmp.lt.s32.totalorder %s762_s16, 1  ;;  %v228_v0 = vld [vmem:[#allocation2 + $0x108] sm:$0xff]  ;;  %v205_v1 = vld [vmem:[#allocation2 + $0x78] sm:$0xff]  ;;  %vm250_vm0 = vcmask 130048  }
  0x17   : > { %v227_v2 = vld [vmem:[#allocation2 + $0x100] sm:$0xff]  ;;  %255 = vmatpush.msra.mxu0 %v228_v0  ;;  %306 = vmatpush.msra.mxu2 %v205_v1  ;;  %v204_v3 = vld [vmem:[#allocation2 + $0x70] sm:$0xff]  ;;  %v226_v4 = vld [vmem:[#allocation2 + $0xf8] sm:$0xff]  ;;  %vm237_vm1 = vcmask 1046528   ;;  %vm379_vm2 = vcmask 1045504   ;;  %s178_s9 = sand.u32 1, %s706_s13  }
  0x18   : > { %s182_s4 = scalar_select %p181_p13, %s762_s16, 1  ;;  %v203_v5 = vld [vmem:[#allocation2 + $0x68] sm:$0xff]  ;;  %v230_v6 = vld [vmem:[#allocation2 + $0x118] sm:$0xff]  ;;  %v229_v7 = vld [vmem:[#allocation2 + $0x110] sm:$0xff] }
  0x19   : > { %256 = vmatpush.msra.mxu0 %v227_v2  ;;  %307 = vmatpush.msra.mxu2 %v204_v3  ;;  %v225_v8 = vld [vmem:[#allocation2 + $0xf0] sm:$0xff]  ;;  %v202_v9 = vld [vmem:[#allocation2 + $0x60] sm:$0xff]  ;;  %v372_v10 = vld [vmem:[#allocation2 + $0x198] sm:$0xff]  ;;  %s548_s10 = sshll.u32 %s178_s9, 4  ;;  %s561_s19 = sshll.u32 %s762_s16, 4 }
  0x1a   : > { %s562_s5 = smul.u32 48, %s182_s4  ;;  %292 = vmatpush.msra.mxu1 %v230_v6  ;;  %v224_v11 = vld [vmem:[#allocation2 + $0xe8] sm:$0xff]  ;;  %v201_v12 = vld [vmem:[#allocation2 + $0x58] sm:$0xff]  ;;  %v371_v13 = vld [vmem:[#allocation2 + $0x190] sm:$0xff]  ;;  %s464_s25 = scalar_lea.hbm %s880_s3, %s561_s19 }
  0x1b   : > { %257 = vmatpush.msra.mxu0 %v226_v4  ;;  %308 = vmatpush.msra.mxu2 %v203_v5  ;;  %v207_v14 = vld [vmem:[#allocation2 + $0x88] sm:$0xff]  ;;  %v223_v15 = vld [vmem:[#allocation2 + $0xe0] sm:$0xff]  ;;  %v200_v16 = vld [vmem:[#allocation2 + $0x50] sm:$0xff]  ;;  %s180_s26 = scalar_lea.vmem [#allocation5], %s548_s10  ;;  %s467_s28 = sshll.u32 %s464_s25, 4  ;;  %s468_s28 = int_to_ptr.hbm [resolvable:$true] %s467_s28 }
  0x1c   : > { %293 = vmatpush.msra.mxu1 %v229_v7  ;;  %s804_s8 = scalar_lea.vmem %s877_s0, %s562_s5  ;;  %343 = vmatpush.msra.mxu3 %v207_v14  ;;  %v206_v17 = vld [vmem:[#allocation2 + $0x80] sm:$0xff]  ;;  %v370_v18 = vld [vmem:[#allocation2 + $0x188] sm:$0xff]  ;;  %v222_v20 = vld [vmem:[#allocation2 + $0xd8] sm:$0xff]  ;;  %s465_s27 = sshll.u32 %s180_s26, 4  ;;  %s466_s27 = int_to_ptr.vmem [resolvable:$true] %s465_s27 }
  0x1d   : > { %258 = vmatpush.msra.mxu0 %v225_v8  ;;  %309 = vmatpush.msra.mxu2 %v202_v9  ;;  %v187_v19 = vld [vmem:[%s804_s8 + $0x8] sm:$0xff]  ;;  %v369_v22 = vld [vmem:[#allocation2 + $0x180] sm:$0xff]  ;;  %v221_v24 = vld [vmem:[#allocation2 + $0xd0] sm:$0xff]  ;;  %s453_s16 = scalar_lea.sflag [#allocation4], %s178_s9  ;;  %s662_s29 = sshra.s32 %s468_s28, 4  ;;  %s663_s29 = int_to_ptr.hbm [resolvable:$true] %s662_s29 }
  0x1e   : > { %396 = vmatpush.msrb.mxu1 %v372_v10  ;;  %v199_v21 = vld [vmem:[#allocation2 + $0x48] sm:$0xff]  ;;  %344 = vmatpush.msra.mxu3 %v206_v17  ;;  %v198_v25 = vld [vmem:[#allocation2 + $0x40] sm:$0xff]  ;;  %v197_v27 = vld [vmem:[#allocation2 + $0x38] sm:$0xff]  ;;  %s664_s30 = scalar_lea.hbm %s663_s29, 16  ;;  %s668_s6 = scalar_lea.hbm %s880_s3, 32 }
  0x1f   : > { %259 = vmatpush.msra.mxu0 %v224_v11  ;;  %310 = vmatpush.msra.mxu2 %v201_v12  ;;  %v374_v23 = vld [vmem:[#allocation2 + $0x1a8] sm:$0xff]  ;;  %v368_v28 = vld [vmem:[#allocation2 + $0x178] sm:$0xff]  ;;  %v373_v31 = vld [vmem:[#allocation2 + $0x1a0] sm:$0xff]  ;;  %p665_p0 = scmp.ne.s32.totalorder %s663_s29, %s664_s30  ;;  %p669_p3 = scmp.lt.s32.totalorder %s663_s29, %s880_s3 }
  0x20   : > { %397 = vmatpush.msrb.mxu1 %v371_v13  ;;  %552 = vmatmul.msk.f32.vlgmr.msra.gmra.mxu3 %vm250_vm0, %v187_v19  ;;  %v220_v26 = vld [vmem:[#allocation2 + $0xc8] sm:$0xff]  ;;  %v809_v29 = vld [vmem:[%s804_s8 + $0x18] sm:$0xff]  ;;  %v367_v32 = vld [vmem:[#allocation2 + $0x170] sm:$0xff]  ;;  %p670_p4 = scmp.lt.s32.totalorder %s668_s6, %s664_s30 }
  0x21   : > { %260 = vmatpush.msra.mxu0 %v223_v15  ;;  %311 = vmatpush.msra.mxu2 %v200_v16  ;;  %v209_v30 = vld [vmem:[%s804_s8 + $0x8] sm:$0xfe]  ;;  %v219_v33 = vld [vmem:[#allocation2 + $0xc0] sm:$0xff]  ;;  %v196_v34 = vld [vmem:[#allocation2 + $0x30] sm:$0xff]  ;;  %v242_v37 = vrot.slane %v809_v29, 1  ;;  %v384_v48 = vrot.slane %v809_v29, 2  ;;  %p666_p1 = pnand %p665_p0, %p779_p5 }
  0x22   : > { %398 = vmatpush.msrb.mxu1 %v370_v18  ;;  %433 = vmatpush.msrb.mxu3 %v374_v23  ;;  %v366_v35 = vld [vmem:[#allocation2 + $0x168] sm:$0xff]  ;;  %v241_v36 = vrot.slane %v209_v30, 1  ;;  %v218_v38 = vld [vmem:[#allocation2 + $0xb8] sm:$0xff]  ;;  %v365_v40 = vld [vmem:[#allocation2 + $0x160] sm:$0xff]  ;;  %p671_p7 = por %p670_p4, %p669_p3 }
  0x23   : > { %261 = vmatpush.msra.mxu0 %v222_v20  ;;  %312 = vmatpush.msra.mxu2 %v199_v21  ;;  %v195_v39 = vld [vmem:[#allocation2 + $0x28] sm:$0xff]  ;;  %v217_v42 = vld [vmem:[#allocation2 + $0xb0] sm:$0xff]  ;;  %v194_v43 = vld [vmem:[#allocation2 + $0x20] sm:$0xff]  ;;  %p667_p2 = pneg %p666_p1 }
  0x24   : > { %399 = vmatpush.msrb.mxu1 %v369_v22  ;;  %434 = vmatpush.msrb.mxu3 %v373_v31  ;;  %v353_v41 = vld [vmem:[%s804_s8 + $0x8] sm:$0xfc]  ;;  %v243_v44 = vsel %vm237_vm1, %v241_v36, %v242_v37  ;;  %v193_v46 = vld [vmem:[#allocation2 + $0x18] sm:$0xff]  ;;  %v819_v49 = vld [vmem:[%s804_s8 + $0x10] sm:$0xff] }
  0x25   : > { %262 = vmatpush.msra.mxu0 %v221_v24  ;;  %313 = vmatpush.msra.mxu2 %v198_v25  ;;  %v216_v45 = vld [vmem:[#allocation2 + $0xa8] sm:$0xff]  ;;  %v383_v47 = vrot.slane %v353_v41, 2  ;;  %v208_v50 = vld [vmem:[%s804_s8] sm:$0xfe]  ;;  %v364_v51 = vld [vmem:[#allocation2 + $0x158] sm:$0xff]  ;;  %v239_v57 = vrot.slane %v819_v49, 1  ;;  %p672_p8 = pnand %p671_p7, %p667_p2 }
  0x26   : > { %400 = vmatpush.msrb.mxu1 %v368_v28  ;;  %v211_v52 = vld [vmem:[%s804_s8 + $0x28] sm:$0x1]  ;;  %v215_v53 = vld [vmem:[#allocation2 + $0xa0] sm:$0xff]  ;;  %v192_v54 = vld [vmem:[#allocation2 + $0x10] sm:$0xff]  ;;  %v238_v56 = vrot.slane %v208_v50, 1  ;;  %v381_v14 = vrot.slane %v819_v49, 2 }
  0x27   : > { %263 = vmatpush.msra.mxu0 %v220_v26  ;;  %314 = vmatpush.msra.mxu2 %v197_v27  ;;  %v363_v55 = vld [vmem:[#allocation2 + $0x150] sm:$0xff]  ;;  %v385_v58 = vsel %vm379_vm2, %v383_v47, %v384_v48  ;;  %v214_v59 = vld [vmem:[#allocation2 + $0x98] sm:$0xff]  ;;  %v191_v60 = vld [vmem:[#allocation2 + $0x8] sm:$0xff]  ;;  %v246_v61 = vrot.slane %v211_v52, 1 }
  0x28   : > { %401 = vmatpush.msrb.mxu1 %v367_v32  ;;  %553 = vmatmul.msk.f32.gmra.mxu3 %vm250_vm0, %v809_v29  ;;  %v355_v62 = vld [vmem:[%s804_s8 + $0x28] sm:$0x3]  ;;  %v213_v0 = vld [vmem:[#allocation2 + $0x90] sm:$0xff]  ;;  %v190_v1 = vld [vmem:[#allocation2] sm:$0xff]  ;;  %v240_v3 = vsel %vm237_vm1, %v238_v56, %v239_v57 }
  0x29   : > { %264 = vmatpush.msra.mxu0 %v219_v33  ;;  %315 = vmatpush.msra.mxu2 %v196_v34  ;;  %v362_v63 = vld [vmem:[#allocation2 + $0x148] sm:$0xff]  ;;  %v361_v2 = vld [vmem:[#allocation2 + $0x140] sm:$0xff]  ;;  %v388_v4 = vrot.slane %v355_v62, 2  ;;  %v247_v5 = vsel %vm237_vm1, %v242_v37, %v246_v61  ;;  %v360_v8 = vld [vmem:[#allocation2 + $0x138] sm:$0xff] }
  0x2a   : > { %402 = vmatpush.msrb.mxu1 %v366_v35  ;;  %v186_v6 = vld [vmem:[%s804_s8] sm:$0xff]  ;;  %v359_v10 = vld [vmem:[#allocation2 + $0x130] sm:$0xff]  ;;  %v358_v15 = vld [vmem:[#allocation2 + $0x128] sm:$0xff] }
  0x2b   : > { %265 = vmatpush.msra.mxu0 %v218_v38  ;;  %316 = vmatpush.msra.mxu2 %v195_v39  ;;  %v210_v7 = vld [vmem:[%s804_s8 + $0x20] sm:$0x1]  ;;  %v352_v9 = vld [vmem:[%s804_s8] sm:$0xfc]  ;;  %v389_v12 = vsel %vm379_vm2, %v384_v48, %v388_v4 }
  0x2c   : > { %403 = vmatpush.msrb.mxu1 %v365_v40  ;;  %v244_v11 = vrot.slane %v210_v7, 1  ;;  %v380_v13 = vrot.slane %v352_v9, 2  ;;  %v357_v16 = vld [vmem:[#allocation2 + $0x120] sm:$0xff] }
  0x2d   : > { %266 = vmatpush.msra.mxu0 %v217_v42  ;;  %317 = vmatpush.msra.mxu2 %v194_v43  ;;  %v354_v19 = vld [vmem:[%s804_s8 + $0x20] sm:$0x3] }
  0x2e   : > { %550 = vmatmul.msk.f32.vlgmr.msra.gmra.mxu1 %vm250_vm0, %v243_v44  ;;  %v245_v17 = vsel %vm237_vm1, %v239_v57, %v244_v11  ;;  %v382_v18 = vsel %vm379_vm2, %v380_v13, %v381_v14  ;;  %v386_v20 = vrot.slane %v354_v19, 2  ;;  %v617_v34 = vld [vmem:[%s879_s2] ss:$0 sm:$0xff] }
  0x2f   : > { %267 = vmatpush.msra.mxu0 %v216_v45  ;;  %318 = vmatpush.msra.mxu2 %v193_v46 }
  0x30   : > { %404 = vmatpush.msrb.mxu1 %v364_v51  ;;  %554 = vmatmul.msk.f32.vlgmr.msrb.gmra.mxu3 %vm250_vm0, %v385_v58  ;;  %v387_v21 = vsel %vm379_vm2, %v381_v14, %v386_v20 }
  0x31   : > { %268 = vmatpush.msra.mxu0 %v215_v53  ;;  %319 = vmatpush.msra.mxu2 %v192_v54 }
  0x32   : > { %405 = vmatpush.msrb.mxu1 %v363_v55 }
  0x33   : > { %269 = vmatpush.msra.mxu0 %v214_v59  ;;  %320 = vmatpush.msra.mxu2 %v191_v60 }
  0x34   : > { %406 = vmatpush.msrb.mxu1 %v362_v63 }
  0x35   : > { %270 = vmatpush.msra.mxu0 %v213_v0  ;;  %321 = vmatpush.msra.mxu2 %v190_v1 }
  0x36   : > { %407 = vmatpush.msrb.mxu1 %v361_v2  ;;  %271 = vmatmul.f32.vlgmr.msra.gmra.mxu0 %v240_v3 }
  0x37   : > { %551 = vmatmul.msk.f32.gmra.mxu1 %vm250_vm0, %v247_v5  ;;  %322 = vmatmul.f32.vlgmr.msra.gmra.mxu2 %v186_v6 }
  0x38   : > { %408 = vmatpush.msrb.mxu1 %v360_v8  ;;  %555 = vmatmul.msk.f32.gmra.mxu3 %vm250_vm0, %v389_v12 }
  0x3a   : > { %409 = vmatpush.msrb.mxu1 %v359_v10 }
  0x3c   : > { %410 = vmatpush.msrb.mxu1 %v358_v15 }
  0x3e   : > { %411 = vmatpush.msrb.mxu1 %v357_v16  ;;  %274 = vmatmul.f32.gmra.mxu0 %v245_v17 }
  0x3f   : > { %325 = vmatmul.f32.gmra.mxu2 %v819_v49  ;;  %412 = vmatmul.f32.vlgmr.msrb.gmra.mxu1 %v382_v18 }
  0x47   : > { %415 = vmatmul.f32.gmra.mxu1 %v387_v21 }
  0xa3   : > { %v346_v22 = vpop.f32.mrf.mxu3 }
  0xab   : > { %v295_v23 = vpop.f32.mrf.mxu1  ;;  %v349_v24 = vpop.f32.mrf.mxu3 }
  0xb3   : > { %v272_v25 = vpop.f32.mrf.mxu0  ;;  %v436_v27 = vpop.f32.mrf.mxu3 }
  0xb4   : > { %v298_v26 = vpop.f32.mrf.mxu1  ;;  %v296_v28 = vadd.f32 %v295_v23, %v272_v25 }
  0xba   : > { %v323_v29 = vpop.f32.mrf.mxu2 }
  0xbb   : > { %v324_v30 = vadd.f32 %v323_v29, %v296_v28  ;;  %v275_v35 = vpop.f32.mrf.mxu0  ;;  %v439_v40 = vpop.f32.mrf.mxu3 }
  0xbc   : > { %v413_v31 = vpop.f32.mrf.mxu1  ;;  %v299_v37 = vadd.f32 %v298_v26, %v275_v35 }
  0xbd   : > { %v347_v32 = vadd.f32 %v346_v22, %v324_v30  ;;  %v437_v33 = vadd.f32 %v436_v27, %v413_v31 }
  0xbf   : > { %v442_v36 = vadd.f32 %v437_v33, %v347_v32 }
  0xc1   : > { %v448_v38 = vadd.f32 %v617_v34, %v442_v36 }
  0xc2   : > { %v326_v39 = vpop.f32.mrf.mxu2 }
  0xc3   : > { %450 = vst [vmem:[%s180_s26] sm:$0xff] %v448_v38  ;;  %v327_v41 = vadd.f32 %v326_v39, %v299_v37 }
  0xc4   : > { %v416_v42 = vpop.f32.mrf.mxu1 }
  0xc5   : > { %v350_v43 = vadd.f32 %v349_v24, %v327_v41  ;;  %v440_v44 = vadd.f32 %v439_v40, %v416_v42 }
  0xc7   : > { %v443_v45 = vadd.f32 %v440_v44, %v350_v43 }
  0xc9   : > { %v449_v46 = vadd.f32 %v617_v34, %v443_v45 }
  0xcb   : > { %451 = vst [vmem:[%s180_s26 + $0x8] sm:$0xff] %v449_v46 }
  0xcc   : > { %675 = shalt.err (!%p672_p8)
}
  0xcd   : > { %s719_s9 = smov 128   ;;  %s720_s10 = smov 8  }
  0xce   : > { %567 = dma.vmem_to_hbm [thread:$0]  (%p779_p5), %s466_s27, 256, %s468_s28, %s453_s16, %s719_s9, %s719_s9, %s720_s10  }
  0xcf PF: > { %p579_p9 = scmp.ge.s32.totalorder %s714_s15, 2  ;;  %s482_s11 = sand.u32 1, %s702_s12  }
  0xd0   : > { %s483_s17 = scalar_lea.sflag [#allocation4], %s482_s11 }
  0xd1   : > { %p574_p10 = pnand %p579_p9, %p783_p6 }
  0xd3   : > { %p575_p11 = pneg %p574_p10 }
  0xd5   : > { %697 = dma.done.wait (%p575_p11), %s483_s17, 256  }
  0xd6   : > { %699 = vsyncadd (%p575_p11), %s483_s17, 4294967040  ;;  %p14_p12 = scmp.ge.s32.totalorder %s766_s18, 4   ;;  %s883_s12 = smov %s706_s13 }
  0xd7   : > { %s884_s13 = smov %s710_s14  ;;  %s885_s14 = smov %s777_s21 }
  0xd8   : > { %s886_s15 = smov %s766_s18  ;;  %16 = sbr.rel (!%p14_p12) target bundleno = 4 (0x4), region = 74 }
  0xdd   :  { %489 = vsyncpa [#allocation3], 1 }
  0xde   :  { %491 = vsyncpa [#allocation3 + $0x1], 1 }
  0xdf   :  { %492 = vsyncpa [#allocation4], 1 }
  0xe0   :  { %494 = vsyncpa [#allocation4 + $0x1], 1 }

</bundles_post_ra>
